<compile_context>
chip_gen: v7x
topology: tpu7x:2x2x1
jax: 0.10.0
libtpu: 0.0.40
codegen_flags: <defaults>
</compile_context>

<pallas_src>
import functools

import jax
import jax.numpy as jnp
import numpy as np
from jax.experimental import pallas as pl
from jax.experimental.pallas import tpu as pltpu

OUT_CHANNELS = 16
IN_CHANNELS = 3
KERNEL_SIZE = (3, 3, 3)
POOL_SIZE = (2, 2, 2)
DIVISOR = 2.0
SUM_DIM = 1


def _fused_kernel(p_ref, w_ref, cb_ref, o_ref, *, bb, nblk, k_dim, cout,
                  inv_n_pool):
    # p_ref : (bb, 8, nblk, K) bf16  im2col patches
    # w_ref : (K, Cout)        bf16  conv weights, pre-scaled by 1/divisor
    # cb_ref: (1, Cout)        f32   conv_bias/divisor + sum(bias)/Cout
    # o_ref : (1, bb, 128)     f32   per-batch scalar broadcast across 128 lanes
    p = p_ref[...].reshape(bb * 8 * nblk, k_dim)
    c = jnp.dot(p, w_ref[...], preferred_element_type=jnp.float32)  # one MXU push
    c = c + cb_ref[...]          # conv bias (+ folded output-bias), already /divisor

    rows = []
    for b in range(bb):          # bb is small & static -> unrolled
        cblk = c[b * 8 * nblk:(b + 1) * 8 * nblk].reshape(8, nblk, cout)
        m = jnp.max(cblk, axis=0)                 # 2x2x2 max-pool (one VPU reduce)
        total = jnp.sum(m) * inv_n_pool           # global avg pool + sum over channels
        rows.append(jnp.broadcast_to(total, (1, 128)))
    # lane-dense (128-wide) unmasked store; tiny (bb*512 B) per-step writeback
    o_ref[...] = jnp.concatenate(rows, axis=0).reshape(1, bb, 128)


def fused_forward(x, conv_w, conv_b, bias, divisor=DIVISOR):
    """x: (B, Cin, D, H, W) NCDHW like PyTorch. Returns (B, 1, 1, 1)."""
    B, Cin, D, H, W = x.shape
    Cout = conv_w.shape[0]
    kd, kh, kw = conv_w.shape[2], conv_w.shape[3], conv_w.shape[4]
    Do, Ho, Wo = D - kd + 1, H - kh + 1, W - kw + 1
    Dp, Hp, Wp = Do // POOL_SIZE[0], Ho // POOL_SIZE[1], Wo // POOL_SIZE[2]
    nblk = Dp * Hp * Wp
    K = Cin * kd * kh * kw
    inv_div = 1.0 / divisor

    # --- JAX glue: im2col in bf16 directly from NCDHW (no NDHWC pre-transpose),
    #     K ordered (cin, kd, kh, kw) to match conv_w.reshape(Cout, K).
    xb = x.astype(jnp.bfloat16)
    cols = [xb[:, :, a:a + 2 * Dp, b:b + 2 * Hp, c:c + 2 * Wp]
            for a in range(kd) for b in range(kh) for c in range(kw)]
    pat = jnp.stack(cols, axis=2)                        # (B, Cin, kk, 2Dp, 2Hp, 2Wp)
    pat = pat.reshape(B, K, Dp, 2, Hp, 2, Wp, 2)
    pat = jnp.transpose(pat, (0, 3, 5, 7, 2, 4, 6, 1))   # (B, 2,2,2, Dp,Hp,Wp, K)
    patches = pat.reshape(B, 8, nblk, K)

    w2 = (conv_w.reshape(Cout, K).T.astype(jnp.float32) * inv_div).astype(jnp.bfloat16)
    cb2 = (conv_b.astype(jnp.float32) * inv_div
           + jnp.sum(bias.astype(jnp.float32)) / Cout).reshape(1, Cout)

    # --- batch-block size: amortize per-grid-step overhead while keeping the
    # double-buffered bf16 patch block (2 * bb*8*nblk*K*2B) well under every
    # generation's default scoped VMEM (v5e 16 MiB, v7x 64 MiB physical), and
    # keep >= 2 grid steps so v7x's two TensorCores both get work.
    per_batch_bytes = 8 * nblk * K * 2
    bb = max(1, min(B, (4 * 1024 * 1024) // per_batch_bytes))
    if B >= 2:
        bb = min(bb, (B + 1) // 2)
    B_pad = ((B + bb - 1) // bb) * bb
    if B_pad != B:
        patches = jnp.pad(patches, ((0, B_pad - B), (0, 0), (0, 0), (0, 0)))
    G = B_pad // bb

    kernel = functools.partial(_fused_kernel, bb=bb, nblk=nblk, k_dim=K,
                               cout=Cout, inv_n_pool=1.0 / nblk)

    out = pl.pallas_call(
        kernel,
        out_shape=jax.ShapeDtypeStruct((G, bb, 128), jnp.float32),
        grid_spec=pltpu.PrefetchScalarGridSpec(
            num_scalar_prefetch=0,
            grid=(G,),
            in_specs=[
                pl.BlockSpec((bb, 8, nblk, K), lambda i: (i, 0, 0, 0)),
                pl.BlockSpec((K, Cout), lambda i: (0, 0)),
                pl.BlockSpec((1, Cout), lambda i: (0, 0)),
            ],
            out_specs=pl.BlockSpec((1, bb, 128), lambda i: (i, 0, 0)),
        ),
        compiler_params=pltpu.CompilerParams(
            dimension_semantics=("parallel",)),
    )(patches, w2, cb2)

    # lane 0 of each row block holds the per-batch scalar
    return out[:, :, 0].reshape(B_pad)[:B].reshape(B, 1, 1, 1)


def reference(x, conv_w, conv_b, bias, divisor):
    """Pure-JAX reference mirroring the PyTorch module_fn (f32 throughout)."""
    y = jax.lax.conv_general_dilated(
        x, conv_w, window_strides=(1, 1, 1), padding="VALID",
        dimension_numbers=("NCDHW", "OIDHW", "NCDHW"))
    y = y + conv_b.reshape(1, -1, 1, 1, 1)
    y = y / divisor
    y = jax.lax.reduce_window(y, -jnp.inf, jax.lax.max,
                              (1, 1, 2, 2, 2), (1, 1, 2, 2, 2), "VALID")
    y = jnp.mean(y, axis=(2, 3, 4), keepdims=True)   # adaptive_avg_pool3d -> (1,1,1)
    y = y + bias[None]                                # (1, C, 1, 1, 1) broadcast
    return jnp.sum(y, axis=SUM_DIM)                   # (B, 1, 1, 1)


if __name__ == "__main__":
    B = 2
    Cin, Cout = IN_CHANNELS, OUT_CHANNELS
    D = H = W = 10

    key = jax.random.PRNGKey(0)
    k1, k2, k3, k4 = jax.random.split(key, 4)
    fan_in = Cin * KERNEL_SIZE[0] * KERNEL_SIZE[1] * KERNEL_SIZE[2]
    bound = 1.0 / np.sqrt(fan_in)
    conv_w = jax.random.uniform(k1, (Cout, Cin, *KERNEL_SIZE), jnp.float32,
                                -bound, bound)
    conv_b = jax.random.uniform(k2, (Cout,), jnp.float32, -bound, bound)
    bias = jax.random.normal(k3, (Cout, 1, 1, 1), dtype=jnp.float32) * 0.02
    x = jax.random.normal(k4, (B, Cin, D, H, W), dtype=jnp.float32)

    out = jax.block_until_ready(fused_forward(x, conv_w, conv_b, bias))
    ref = jax.block_until_ready(reference(x, conv_w, conv_b, bias, DIVISOR))

    assert out.shape == (B, 1, 1, 1) and ref.shape == (B, 1, 1, 1), (out.shape, ref.shape)
    if not np.allclose(np.asarray(out), np.asarray(ref), atol=5e-2, rtol=5e-2):
        raise AssertionError(f"Pallas kernel mismatch:\n{out}\nvs reference\n{ref}")
    print("KERNEL_OK")
</pallas_src>

<mosaic_0001>
module attributes {stable_mosaic.version = 11 : i64} {
  func.func @_fused_kernel(%arg0: i32, %arg1: memref<1x8x64x81xbf16, #tpu.memory_space<vmem>>, %arg2: memref<81x16xbf16, #tpu.memory_space<vmem>>, %arg3: memref<1x16xf32, #tpu.memory_space<vmem>>, %arg4: memref<1x1x128xf32, #tpu.memory_space<vmem>>) attributes {dimension_semantics = [#tpu.dimension_semantics<parallel>], iteration_bounds = array<i64: 2>, scalar_prefetch = 0 : i64, scratch_operands = 0 : i64, tpu.core_type = #tpu.core_type<tc>, window_params = [{transform_indices = @transform_0, window_bounds = array<i64: 1, 8, 64, 81>}, {pipeline_mode = #tpu.pipeline_mode<synchronous>, transform_indices = @transform_1, window_bounds = array<i64: 81, 16>}, {pipeline_mode = #tpu.pipeline_mode<synchronous>, transform_indices = @transform_2, window_bounds = array<i64: 1, 16>}, {transform_indices = @transform_3, window_bounds = array<i64: 1, 1, 128>}]} {
    %c0 = arith.constant 0 : index
    %c0_0 = arith.constant 0 : index
    %c0_1 = arith.constant 0 : index
    %c0_2 = arith.constant 0 : index
    %0 = vector.load %arg1[%c0, %c0_0, %c0_1, %c0_2] : memref<1x8x64x81xbf16, #tpu.memory_space<vmem>>, vector<1x8x64x81xbf16>
    %1 = vector.shape_cast %0 : vector<1x8x64x81xbf16> to vector<512x81xbf16>
    %c0_3 = arith.constant 0 : index
    %c0_4 = arith.constant 0 : index
    %2 = vector.load %arg2[%c0_3, %c0_4] : memref<81x16xbf16, #tpu.memory_space<vmem>>, vector<81x16xbf16>
    %cst = arith.constant dense<0.000000e+00> : vector<512x16xf32>
    %3 = tpu.matmul %1, %2, %cst {dimension_numbers = #tpu.dot_dimension_numbers<[1], [0], [0], [1], [0, 0, 1, 1], [], []>} : vector<512x81xbf16>, vector<81x16xbf16>, vector<512x16xf32> -> vector<512x16xf32>
    %c0_5 = arith.constant 0 : index
    %c0_6 = arith.constant 0 : index
    %4 = vector.load %arg3[%c0_5, %c0_6] : memref<1x16xf32, #tpu.memory_space<vmem>>, vector<1x16xf32>
    %5 = vector.broadcast %4 : vector<1x16xf32> to vector<512x16xf32>
    %6 = arith.addf %3, %5 : vector<512x16xf32>
    %7 = vector.shape_cast %6 : vector<512x16xf32> to vector<8x64x16xf32>
    %cst_7 = arith.constant dense<0xFF800000> : vector<64x16xf32>
    %8 = vector.multi_reduction <maximumf>, %7, %cst_7 [0] : vector<8x64x16xf32> to vector<64x16xf32>
    %9 = vector.shape_cast %8 : vector<64x16xf32> to vector<1x64x16xf32>
    %cst_8 = arith.constant dense<0.000000e+00> : vector<1xf32>
    %10 = vector.multi_reduction <add>, %9, %cst_8 [1, 2] : vector<1x64x16xf32> to vector<1xf32>
    %11 = vector.shape_cast %10 : vector<1xf32> to vector<1x1x1xf32>
    %12 = vector.extract %11[0, 0, 0] : f32 from vector<1x1x1xf32>
    %cst_9 = arith.constant 1.562500e-02 : f32
    %13 = arith.mulf %12, %cst_9 : f32
    %14 = vector.broadcast %13 : f32 to vector<1x128xf32>
    %15 = vector.shape_cast %14 : vector<1x128xf32> to vector<1x1x128xf32>
    %c0_10 = arith.constant 0 : index
    %c0_11 = arith.constant 0 : index
    %c0_12 = arith.constant 0 : index
    %16 = vector.load %arg4[%c0_10, %c0_11, %c0_12] : memref<1x1x128xf32, #tpu.memory_space<vmem>>, vector<1x1x128xf32>
    tpu.vector_store %arg4[%c0_10, %c0_11, %c0_12], %15 {strides = array<i32>} : memref<1x1x128xf32, #tpu.memory_space<vmem>>, vector<1x1x128xf32>,
    return
  }
  func.func @transform_0(%arg0: i32) -> (i32, i32, i32, i32) {
    %c0_i32 = arith.constant 0 : i32
    %c0_i32_0 = arith.constant 0 : i32
    %c0_i32_1 = arith.constant 0 : i32
    %c0_i32_2 = arith.constant 0 : i32
    return %arg0, %c0_i32, %c0_i32_0, %c0_i32_1 : i32, i32, i32, i32
  }
  func.func @transform_1(%arg0: i32) -> (i32, i32) {
    %c0_i32 = arith.constant 0 : i32
    %c0_i32_0 = arith.constant 0 : i32
    %c0_i32_1 = arith.constant 0 : i32
    return %c0_i32, %c0_i32_0 : i32, i32
  }
  func.func @transform_2(%arg0: i32) -> (i32, i32) {
    %c0_i32 = arith.constant 0 : i32
    %c0_i32_0 = arith.constant 0 : i32
    %c0_i32_1 = arith.constant 0 : i32
    return %c0_i32, %c0_i32_0 : i32, i32
  }
  func.func @transform_3(%arg0: i32) -> (i32, i32, i32) {
    %c0_i32 = arith.constant 0 : i32
    %c0_i32_0 = arith.constant 0 : i32
    %c0_i32_1 = arith.constant 0 : i32
    return %arg0, %c0_i32, %c0_i32_0 : i32, i32, i32
  }
}

</mosaic_0001>

<bundles_post_ra>
// kernel: tpu_custom_call.1
= control target key start
LH: loop header
LB: loop body
LE: loop exit
PB: predicated region body
PF: predicated region fallthrough
CT: control target
= control target key end

     0   :  { %8 = vsyncpa [#allocation3], 0  ;;  %s2058_s0 = inlined_call_operand.hbm [shape: bf16[2,8,64,81], index: 0, kind: input, shape index: {}]   ;;  %s2059_s1 = inlined_call_operand.vmem [shape: bf16[81,16], index: 1, kind: input, shape index: {}]   ;;  %s2060_s2 = inlined_call_operand.vmem [shape: f32[1,16], index: 2, kind: input, shape index: {}]   ;;  %s2061_s3 = inlined_call_operand.hbm [shape: f32[2,1,128], index: 3, kind: output, shape index: {}]  }
   0x1   :  { %10 = vsyncpa [#allocation3 + $0x1], 0 }
   0x2   :  { %11 = vsyncpa [#allocation4], 0 }
   0x3   :  { %13 = vsyncpa [#allocation4 + $0x1], 0  ;;  %s1504_s12 = smov 0   ;;  %s1506_s13 = smov 0  }
   0x4   :  { %s1508_s14 = smov 0   ;;  %s1510_s15 = smov 0  }
   0x5 LB: > { %s1525_s16 = sadd.s32 4294967295, %s1477_s15   ;;  %s1083_s17 = sadd.s32 4294967294, %s1477_s15   ;;  %s1477_s15 = sphi %s1510_s15, %s2074_s15   ;;  %s1473_s14 = sphi %s1508_s14, %s2073_s14   ;;  %s1469_s13 = sphi %s1506_s13, %s2072_s13   ;;  %s1465_s12 = sphi %s1504_s12, %s2071_s12  }
   0x6   : > { %s1529_s18 = sadd.s32 1, %s1477_s15   ;;  %s26_s19 = sadd.s32 1, %s1473_s14 }
   0x7   : > { %s23_s20 = ssub.s32 %s1477_s15, %s1529_s18  ;;  %p33_p0 = scmp.ne.s32.totalorder %s1473_s14, %s1469_s13 }
   0x8   : > { %p24_p1 = scmp.eq.s32.totalorder %s23_s20, 0  ;;  %p34_p2 = scmp.eq.s32.totalorder %s1477_s15, 0 }
   0x9   : > { %p39_p3 = scmp.ne.s32.totalorder %s1469_s13, %s1465_s12  ;;  %p40_p4 = scmp.eq.s32.totalorder %s1525_s16, 0 }
   0xa   : > { %s1541_s21 = scalar_select %p24_p1, %s1473_s14, %s26_s19  }
   0xb   : > { %p1543_p5 = por %p34_p2, %p33_p0  ;;  %p1547_p6 = por %p40_p4, %p39_p3 }
   0xc   : > { %p105_p7 = scmp.eq.s32.totalorder %s1525_s16, 1  ;;  %p111_p8 = scmp.eq.s32.totalorder %s1083_s17, 1 }
   0xd   : > { %p1306_p10 = scmp.lt.s32.totalorder %s1477_s15, 2  ;;  %s137_s26 = sand.u32 1, %s1473_s14  }
   0xe   : > { %p1554_p11 = por %p105_p7, %p33_p0  ;;  %p1558_p12 = por %p111_p8, %p39_p3 }
   0xf   : > { %s1165_s27 = sshll.u32 %s1477_s15, 12  ;;  %s1086_s28 = sshll.u32 %s137_s26, 8 }
  0x10   : > { %s2065_s24 = scalar_select %p1554_p11, 1, 0 }
  0x11   : > { %s2066_s25 = scalar_select %p1558_p12, 1, 0 }
  0x12   : > { %s1567_s4 = scalar_lea.hbm %s2058_s0, %s1165_s27  ;;  %s141_s5 = scalar_lea.vmem [#allocation2], %s1086_s28 }
  0x13   : > { %s148_s6 = sshll.u32 %s141_s5, 4  ;;  %p1571_p13 = pnand %p1306_p10, %p1543_p5  ;;  %s1575_s6 = int_to_ptr.vmem [resolvable:$true] %s148_s6 }
  0x14   : > { %s1577_s8 = scalar_lea.sflag [#allocation3], %s137_s26  ;;  %s1381_s9 = scalar_lea.hbm %s1567_s4, 4096 }
  0x15   : > { %p1382_p0 = scmp.ne.s32.totalorder %s1567_s4, %s1381_s9  ;;  %p1383_p1 = pneg %p1571_p13 }
  0x16   : > { %s1386_s17 = scalar_lea.hbm %s2058_s0, 8192  ;;  %p1387_p4 = scmp.lt.u32.totalorder %s1567_s4, %s2058_s0 }
  0x17   : > { %p1384_p2 = pnand %p1383_p1, %p1382_p0  ;;  %p1388_p5 = scmp.lt.u32.totalorder %s1386_s17, %s1381_s9 }
  0x18   : > { %p1390_p8 = scmp.lt.u32.totalorder %s1381_s9, %s1567_s4 }
  0x19   : > { %p1385_p3 = pneg %p1384_p2  ;;  %p1389_p7 = por %p1388_p5, %p1387_p4 }
  0x1b   : > { %p1391_p10 = por %p1390_p8, %p1389_p7 }
  0x1d   : > { %p1392_p9 = pnand %p1391_p10, %p1385_p3 }
  0x1f   : > { %1395 = shalt.err (!%p1392_p9)
}
  0x20   : > { %s1396_s22 = scalar_lea.vmem %s1575_s6, 4096  ;;  %s1479_s26 = smov [#allocation2]  }
  0x21   : > { %p1397_p0 = scmp.ne.s32.totalorder %s1575_s6, %s1396_s22  ;;  %s1401_s27 = sshll.u32 %s1479_s26, 4  ;;  %s1402_s27 = int_to_ptr.vmem [resolvable:$false] %s1401_s27 }
  0x22   : > { %s1403_s28 = scalar_lea.vmem %s1402_s27, 8192  ;;  %p1404_p11 = scmp.lt.s32.totalorder %s1575_s6, %s1402_s27 }
  0x23   : > { %p1399_p2 = pnand %p1397_p0, %p1383_p1  ;;  %p1405_p4 = scmp.lt.s32.totalorder %s1403_s28, %s1396_s22 }
  0x25   : > { %p1400_p12 = pneg %p1399_p2  ;;  %p1406_p5 = por %p1405_p4, %p1404_p11 }
  0x27   : > { %p1407_p7 = pnand %p1406_p5, %p1400_p12 }
  0x29   : > { %1410 = shalt.err (!%p1407_p7)
}
  0x2a   : > { %s1480_s29 = smov 64   ;;  %s1481_s30 = smov 4  }
  0x2b   : > { %1301 = dma.hbm_to_vmem [thread:$0]  (!%p1571_p13), %s1567_s4, 4096, %s1575_s6, %s1577_s8, %s1480_s29, %s1480_s29, %s1481_s30  }
  0x2c   : > { %p1089_p9 = scmp.ge.s32.totalorder %s1477_s15, 1  ;;  %p156_p1 = scmp.lt.s32.totalorder %s1477_s15, 3 }
  0x2e   : > { %p157_p3 = pnand %p1089_p9, %p156_p1 }
  0x2f   : > { %s1608_s5 = sand.u32 (!%p157_p3), 1, %s1469_s13  }
  0x30   : > { %160 = sbr.rel (%p157_p3) target bundleno = 596 (0x254), region = 32  ;;  %s1090_s9 = sshll.u32 (!%p157_p3), %s1608_s5, 8 }
  0x31   : > { %s163_s10 = scalar_lea.sflag (!%p157_p3), [#allocation3], %s1608_s5  ;;  %s1612_s11 = scalar_lea.vmem (!%p157_p3), [#allocation2], %s1090_s9 }
  0x37   : > { %1456 = dma.done.wait (%p1547_p6), %s163_s10, 4096  }
  0x38   : > { %1458 = vsyncadd (%p1547_p6), %s163_s10, 4294963200  ;;  %v1343_v0 = vld [vmem:[%s2059_s1] sm:$0xff]   ;;  %v1344_v1 = vld [vmem:[%s2059_s1 + $0x8] sm:$0xff]   ;;  %vm464_vm0 = vcmask 662528   ;;  %vm561_vm1 = vcmask 1040384   ;;  %v1482_v8 = vmov 0  }
  0x39   : > { %1204 = vmatprep.subr.bf16.mxu0 %v1343_v0  ;;  %1280 = vmatprep.subr.bf16.mxu1 %v1343_v0  ;;  %v1345_v2 = vld [vmem:[%s2059_s1 + $0x10] sm:$0xff]   ;;  %v1349_v3 = vld [vmem:[%s1612_s11] sm:$0xff]   ;;  %v1346_v4 = vld [vmem:[%s2059_s1 + $0x18] sm:$0xff]   ;;  %v563_v9 = vsel %vm561_vm1, 65535, %v1482_v8  ;;  %vm856_vm2 = vcmask 130048   ;;  %s187_s9 = scalar_lea.vmem [#allocation5], %s1608_s5 }
  0x3a   : > { %1205 = vmatpush3.bf16.msra.mxu0 %v1343_v0  ;;  %1286 = vmatpush3.bf16.msra.mxu1 %v1343_v0  ;;  %v1351_v5 = vld [vmem:[%s1612_s11 + $0x80] sm:$0xff]   ;;  %v1348_v6 = vld [vmem:[%s2059_s1 + $0x28] ss:$0 sps:$4 sm:$0x11]   ;;  %v1353_v13 = vld [vmem:[%s1612_s11 + $0x10] sm:$0xff]   ;;  %s1017_s10 = sshll.u32 %s187_s9, 4  ;;  %s2016_s10 = int_to_ptr.vmem [resolvable:$true] %s1017_s10 }
  0x3b   : > { %1206 = vmatprep.subr.bf16.mxu0 %v1344_v1  ;;  %1281 = vmatprep.subr.bf16.mxu1 %v1344_v1  ;;  %v1347_v7 = vld [vmem:[%s2059_s1 + $0x20] sm:$0xff]   ;;  %v565_v10 = vand.u32 %v1348_v6, %v563_v9  ;;  %v1350_v11 = vld [vmem:[%s1612_s11 + $0x8] sm:$0xff]   ;;  %v1355_v14 = vld [vmem:[%s1612_s11 + $0x90] sm:$0xff]   ;;  %s1005_s19 = scalar_lea.sflag [#allocation4], %s1608_s5  ;;  %s1411_s23 = scalar_lea.vmem %s2016_s10, 16 }
  0x3c   : > { %1216 = vmatprep.mubr.msk.bf16.mxu0 %vm464_vm0, %v1349_v3  ;;  %1248 = vmatprep.mubr.msk.bf16.mxu1 %vm464_vm0, %v1351_v5  ;;  %v1352_v12 = vld [vmem:[%s1612_s11 + $0x88] sm:$0xff]   ;;  %v1354_v15 = vld [vmem:[%s1612_s11 + $0x18] sm:$0xff]   ;;  %v1357_v17 = vld [vmem:[%s1612_s11 + $0x20] sm:$0xff]   ;;  %p1412_p6 = scmp.ne.s32.totalorder %s2016_s10, %s1411_s23  ;;  %p2068_p11 = scmp.ne.s32.totalorder %s2065_s24, 0 }
  0x3d   : > { %v1356_v16 = vld [vmem:[%s1612_s11 + $0x98] sm:$0xff]   ;;  %v1359_v18 = vld [vmem:[%s1612_s11 + $0xa0] sm:$0xff]   ;;  %v1358_v19 = vld [vmem:[%s1612_s11 + $0x28] sm:$0xff]  }
  0x3e   : > { %1207 = vmatpush3.bf16.msra.mxu0 %v1344_v1  ;;  %1287 = vmatpush3.bf16.msra.mxu1 %v1344_v1  ;;  %v1360_v20 = vld [vmem:[%s1612_s11 + $0xa8] sm:$0xff]   ;;  %v1361_v21 = vld [vmem:[%s1612_s11 + $0x30] sm:$0xff]   ;;  %v1362_v23 = vld [vmem:[%s1612_s11 + $0x38] sm:$0xff]   ;;  %p1413_p12 = pnand %p1412_p6, %p2068_p11 }
  0x3f   : > { %1208 = vmatprep.subr.bf16.mxu0 %v1345_v2  ;;  %1282 = vmatprep.subr.bf16.mxu1 %v1345_v2  ;;  %v1363_v22 = vld [vmem:[%s1612_s11 + $0xb0] sm:$0xff]   ;;  %v1364_v24 = vld [vmem:[%s1612_s11 + $0xb8] sm:$0xff]   ;;  %v1365_v25 = vld [vmem:[%s1612_s11 + $0x40] sm:$0xff]  }
  0x40   : > { %v1367_v26 = vld [vmem:[%s1612_s11 + $0xc0] sm:$0xff]   ;;  %v1366_v27 = vld [vmem:[%s1612_s11 + $0x48] sm:$0xff]   ;;  %v1369_v29 = vld [vmem:[%s1612_s11 + $0x50] sm:$0xff]   ;;  %p1414_p13 = pneg %p1413_p12 }
  0x41   : > { %v1368_v28 = vld [vmem:[%s1612_s11 + $0xc8] sm:$0xff]   ;;  %v1371_v30 = vld [vmem:[%s1612_s11 + $0xd0] sm:$0xff]   ;;  %v1370_v31 = vld [vmem:[%s1612_s11 + $0x58] sm:$0xff]  }
  0x42   : > { %1209 = vmatpush3.bf16.msra.mxu0 %v1345_v2  ;;  %1288 = vmatpush3.bf16.msra.mxu1 %v1345_v2  ;;  %v1372_v32 = vld [vmem:[%s1612_s11 + $0xd8] sm:$0xff]   ;;  %v1373_v33 = vld [vmem:[%s1612_s11 + $0x60] sm:$0xff]   ;;  %v1374_v35 = vld [vmem:[%s1612_s11 + $0x68] sm:$0xff]  }
  0x43   : > { %1210 = vmatprep.subr.bf16.mxu0 %v1346_v4  ;;  %1283 = vmatprep.subr.bf16.mxu1 %v1346_v4  ;;  %v1375_v34 = vld [vmem:[%s1612_s11 + $0xe0] sm:$0xff]   ;;  %v1376_v36 = vld [vmem:[%s1612_s11 + $0xe8] sm:$0xff]   ;;  %v1377_v37 = vld [vmem:[%s1612_s11 + $0x70] sm:$0xff]  }
  0x44   : > { %v1379_v38 = vld [vmem:[%s1612_s11 + $0xf0] sm:$0xff]   ;;  %v1378_v39 = vld [vmem:[%s1612_s11 + $0x78] sm:$0xff]   ;;  %v1719_v57 = vld [vmem:[%s2060_s2] ss:$0 sm:$0xff] }
  0x45   : > { %v1380_v40 = vld [vmem:[%s1612_s11 + $0xf8] sm:$0xff]   ;;  %s1162_s11 = sshll.u32 %s1525_s16, 4  ;;  %s1483_s16 = smov [#allocation5]  }
  0x46   : > { %1211 = vmatpush3.bf16.msra.mxu0 %v1346_v4  ;;  %1289 = vmatpush3.bf16.msra.mxu1 %v1346_v4  ;;  %s2014_s17 = scalar_lea.hbm %s2061_s3, %s1162_s11  ;;  %s1415_s20 = sshll.u32 %s1483_s16, 4  ;;  %s1416_s20 = int_to_ptr.vmem [resolvable:$false] %s1415_s20 }
  0x47   : > { %1212 = vmatprep.subr.bf16.mxu0 %v1347_v7  ;;  %1284 = vmatprep.subr.bf16.mxu1 %v1347_v7  ;;  %s1417_s22 = scalar_lea.vmem %s1416_s20, 32  ;;  %p1418_p8 = scmp.lt.s32.totalorder %s2016_s10, %s1416_s20 }
  0x48   : > { %p1419_p10 = scmp.lt.s32.totalorder %s1417_s22, %s1411_s23 }
  0x4a   : > { %1213 = vmatpush3.bf16.msra.mxu0 %v1347_v7  ;;  %1290 = vmatpush3.bf16.msra.mxu1 %v1347_v7  ;;  %p1420_p0 = por %p1419_p10, %p1418_p8 }
  0x4b   : > { %1214 = vmatprep.subr.bf16.mxu0 %v565_v10  ;;  %1285 = vmatprep.subr.bf16.mxu1 %v565_v10 }
  0x4c   : > { %p1421_p2 = pnand %p1420_p0, %p1414_p13 }
  0x4e   : > { %1215 = vmatpush3.bf16.msra.mxu0 %v565_v10  ;;  %1291 = vmatpush3.bf16.msra.mxu1 %v565_v10 }
  0x51   : > { %1217 = vmatmul.mubr.msk.bf16.vlgmr.msra.gmra.mrb[0].mxu0 %vm464_vm0, %v1350_v11  ;;  %1249 = vmatmul.mubr.msk.bf16.vlgmr.msra.gmra.mrb[0].mxu1 %vm464_vm0, %v1352_v12 }
  0x52   : > { %1220 = vmatprep.mubr.msk.bf16.mxu0 %vm464_vm0, %v1353_v13  ;;  %1252 = vmatprep.mubr.msk.bf16.mxu1 %vm464_vm0, %v1355_v14 }
  0x59   : > { %1221 = vmatmul.mubr.msk.bf16.gmra.mrb[4].mxu0 %vm464_vm0, %v1354_v15  ;;  %1253 = vmatmul.mubr.msk.bf16.gmra.mrb[4].mxu1 %vm464_vm0, %v1356_v16 }
  0x5a   : > { %1224 = vmatprep.mubr.msk.bf16.mxu0 %vm464_vm0, %v1357_v17  ;;  %1256 = vmatprep.mubr.msk.bf16.mxu1 %vm464_vm0, %v1359_v18 }
  0x61   : > { %1225 = vmatmul.mubr.msk.bf16.gmra.mrb[8].mxu0 %vm464_vm0, %v1358_v19  ;;  %1257 = vmatmul.mubr.msk.bf16.gmra.mrb[8].mxu1 %vm464_vm0, %v1360_v20 }
  0x62   : > { %1228 = vmatprep.mubr.msk.bf16.mxu0 %vm464_vm0, %v1361_v21  ;;  %1260 = vmatprep.mubr.msk.bf16.mxu1 %vm464_vm0, %v1363_v22 }
  0x69   : > { %1229 = vmatmul.mubr.msk.bf16.gmra.mrb[12].mxu0 %vm464_vm0, %v1362_v23  ;;  %1261 = vmatmul.mubr.msk.bf16.gmra.mrb[12].mxu1 %vm464_vm0, %v1364_v24 }
  0x6a   : > { %1232 = vmatprep.mubr.msk.bf16.mxu0 %vm464_vm0, %v1365_v25  ;;  %1264 = vmatprep.mubr.msk.bf16.mxu1 %vm464_vm0, %v1367_v26 }
  0x71   : > { %1233 = vmatmul.mubr.msk.bf16.gmra.mrb[16].mxu0 %vm464_vm0, %v1366_v27  ;;  %1265 = vmatmul.mubr.msk.bf16.gmra.mrb[16].mxu1 %vm464_vm0, %v1368_v28 }
  0x72   : > { %1236 = vmatprep.mubr.msk.bf16.mxu0 %vm464_vm0, %v1369_v29  ;;  %1268 = vmatprep.mubr.msk.bf16.mxu1 %vm464_vm0, %v1371_v30 }
  0x79   : > { %1237 = vmatmul.mubr.msk.bf16.gmra.mrb[20].mxu0 %vm464_vm0, %v1370_v31  ;;  %1269 = vmatmul.mubr.msk.bf16.gmra.mrb[20].mxu1 %vm464_vm0, %v1372_v32 }
  0x7a   : > { %1240 = vmatprep.mubr.msk.bf16.mxu0 %vm464_vm0, %v1373_v33  ;;  %1272 = vmatprep.mubr.msk.bf16.mxu1 %vm464_vm0, %v1375_v34 }
  0x81   : > { %1241 = vmatmul.mubr.msk.bf16.gmra.mrb[24].mxu0 %vm464_vm0, %v1374_v35  ;;  %1273 = vmatmul.mubr.msk.bf16.gmra.mrb[24].mxu1 %vm464_vm0, %v1376_v36 }
  0x82   : > { %1244 = vmatprep.mubr.msk.bf16.mxu0 %vm464_vm0, %v1377_v37  ;;  %1276 = vmatprep.mubr.msk.bf16.mxu1 %vm464_vm0, %v1379_v38 }
  0x89   : > { %1245 = vmatmul.mubr.msk.bf16.gmra.mrb[28].mxu0 %vm464_vm0, %v1378_v39  ;;  %1277 = vmatmul.mubr.msk.bf16.gmra.mrb[28].mxu1 %vm464_vm0, %v1380_v40 }
 0x124   : > { %v1218_v41 = vpop.f32.mrb[0].mxu0  ;;  %v1700_v42 = vpop.f32.mrb[0].mxu1 }
 0x125   : > { %v601_v43 = vpop.f32.mrb[1].mxu0  ;;  %v1702_v44 = vpop.f32.mrb[1].mxu1  ;;  %v610_v58 = vadd.f32 %v1218_v41, %v1719_v57 }
 0x126   : > { %v1219_v45 = vpop.f32.mrb[2].mxu0  ;;  %v1704_v46 = vpop.f32.mrb[2].mxu1  ;;  %v602_v59 = vadd.f32 %v1719_v57, %v601_v43 }
 0x127   : > { %v604_v47 = vpop.f32.mrb[3].mxu0  ;;  %v1706_v48 = vpop.f32.mrb[3].mxu1  ;;  %v613_v62 = vadd.f32 %v1219_v45, %v1719_v57  ;;  %v1734_v6 = vsel %vm856_vm2, %v610_v58, -inf }
 0x128   : > { %v605_v2 = vadd.f32 %v1719_v57, %v604_v47  ;;  %v1743_v11 = vsel %vm856_vm2, %v602_v59, -inf }
 0x129   : > { %v902_v15 = vsel %vm856_vm2, %v613_v62, -inf  ;;  %v738_v62 = vadd.f32 %v1700_v42, %v1719_v57 }
 0x12a   : > { %v1753_v18 = vsel %vm856_vm2, %v605_v2, -inf }
 0x12c   : > { %v1222_v49 = vpop.f32.mrb[4].mxu0  ;;  %v1708_v50 = vpop.f32.mrb[4].mxu1 }
 0x12d   : > { %v617_v51 = vpop.f32.mrb[5].mxu0  ;;  %v1710_v52 = vpop.f32.mrb[5].mxu1  ;;  %v626_v21 = vadd.f32 %v1222_v49, %v1719_v57  ;;  %v754_v42 = vadd.f32 %v1708_v50, %v1719_v57 }
 0x12e   : > { %v1223_v53 = vpop.f32.mrb[6].mxu0  ;;  %v1712_v54 = vpop.f32.mrb[6].mxu1  ;;  %v618_v23 = vadd.f32 %v1719_v57, %v617_v51 }
 0x12f   : > { %v620_v55 = vpop.f32.mrb[7].mxu0  ;;  %v1714_v56 = vpop.f32.mrb[7].mxu1  ;;  %v629_v26 = vadd.f32 %v1223_v53, %v1719_v57  ;;  %v1770_v34 = vsel %vm856_vm2, %v626_v21, -inf }
 0x130   : > { %v621_v30 = vadd.f32 %v1719_v57, %v620_v55  ;;  %v1779_v39 = vsel %vm856_vm2, %v618_v23, -inf  ;;  %v749_v50 = vadd.f32 %v1719_v57, %v1714_v56 }
 0x131   : > { %v1788_v45 = vsel %vm856_vm2, %v629_v26, -inf }
 0x132   : > { %v1796_v51 = vsel %vm856_vm2, %v621_v30, -inf }
 0x134   : > { %v1226_v60 = vpop.f32.mrb[8].mxu0  ;;  %v1723_v61 = vpop.f32.mrb[8].mxu1 }
 0x135   : > { %v642_v63 = vadd.f32 %v1226_v60, %v1719_v57  ;;  %v633_v0 = vpop.f32.mrb[9].mxu0  ;;  %v1727_v1 = vpop.f32.mrb[9].mxu1 }
 0x136   : > { %v634_v3 = vadd.f32 %v1719_v57, %v633_v0  ;;  %v1227_v4 = vpop.f32.mrb[10].mxu0  ;;  %v1731_v5 = vpop.f32.mrb[10].mxu1 }
 0x137   : > { %v1737_v7 = vsel %vm856_vm2, %v642_v63, -inf  ;;  %v645_v8 = vadd.f32 %v1227_v4, %v1719_v57  ;;  %v636_v9 = vpop.f32.mrb[11].mxu0  ;;  %v1740_v10 = vpop.f32.mrb[11].mxu1  ;;  %v741_v4 = vadd.f32 %v1704_v46, %v1719_v57  ;;  %v757_v46 = vadd.f32 %v1712_v54, %v1719_v57 }
 0x138   : > { %v889_v12 = vmax.f32 %v1734_v6, %v1737_v7  ;;  %v858_v13 = vsel %vm856_vm2, %v634_v3, -inf  ;;  %v637_v14 = vadd.f32 %v1719_v57, %v636_v9  ;;  %v730_v3 = vadd.f32 %v1719_v57, %v1702_v44 }
 0x139   : > { %v859_v16 = vmax.f32 %v1743_v11, %v858_v13  ;;  %v903_v17 = vsel %vm856_vm2, %v645_v8, -inf  ;;  %v733_v6 = vadd.f32 %v1719_v57, %v1706_v48  ;;  %v746_v11 = vadd.f32 %v1719_v57, %v1710_v52 }
 0x13a   : > { %v904_v19 = vmax.f32 %v902_v15, %v903_v17  ;;  %v873_v20 = vsel %vm856_vm2, %v637_v14, -inf  ;;  %v1839_v54 = vsel %vm856_vm2, %v730_v3, -inf }
 0x13b   : > { %v874_v22 = vmax.f32 %v1753_v18, %v873_v20  ;;  %v1847_v56 = vsel %vm856_vm2, %v733_v6, -inf }
 0x13c   : > { %v1230_v24 = vpop.f32.mrb[12].mxu0  ;;  %v1759_v25 = vpop.f32.mrb[12].mxu1 }
 0x13d   : > { %v658_v27 = vadd.f32 %v1230_v24, %v1719_v57  ;;  %v649_v28 = vpop.f32.mrb[13].mxu0  ;;  %v1763_v29 = vpop.f32.mrb[13].mxu1  ;;  %v1836_v24 = vsel %vm856_vm2, %v738_v62, -inf  ;;  %v765_v62 = vadd.f32 %v1719_v57, %v1740_v10 }
 0x13e   : > { %v650_v31 = vadd.f32 %v1719_v57, %v649_v28  ;;  %v1231_v32 = vpop.f32.mrb[14].mxu0  ;;  %v1767_v33 = vpop.f32.mrb[14].mxu1 }
 0x13f   : > { %v1773_v35 = vsel %vm856_vm2, %v658_v27, -inf  ;;  %v661_v36 = vadd.f32 %v1231_v32, %v1719_v57  ;;  %v652_v37 = vpop.f32.mrb[15].mxu0  ;;  %v1776_v38 = vpop.f32.mrb[15].mxu1  ;;  %v1856_v27 = vsel %vm856_vm2, %v757_v46, -inf  ;;  %v762_v32 = vadd.f32 %v1719_v57, %v1727_v1 }
 0x140   : > { %v949_v40 = vmax.f32 %v1770_v34, %v1773_v35  ;;  %v1784_v41 = vsel %vm856_vm2, %v650_v31, -inf  ;;  %v653_v43 = vadd.f32 %v1719_v57, %v652_v37  ;;  %v1859_v31 = vsel %vm856_vm2, %v749_v50, -inf }
 0x141   : > { %v919_v47 = vmax.f32 %v1779_v39, %v1784_v41  ;;  %v1793_v49 = vsel %vm856_vm2, %v661_v36, -inf  ;;  %v778_v1 = vadd.f32 %v1719_v57, %v1763_v29  ;;  %v781_v10 = vadd.f32 %v1719_v57, %v1776_v38 }
 0x142   : > { %v964_v53 = vmax.f32 %v1788_v45, %v1793_v49  ;;  %v1801_v55 = vsel %vm856_vm2, %v653_v43, -inf }
 0x143   : > { %v934_v58 = vmax.f32 %v1796_v51, %v1801_v55  ;;  %v1923_v49 = vsel %vm856_vm2, %v778_v1, -inf }
 0x144   : > { %v1234_v59 = vpop.f32.mrb[16].mxu0  ;;  %v1266_v60 = vpop.f32.mrb[16].mxu1 }
 0x145   : > { %v674_v63 = vadd.f32 %v1234_v59, %v1719_v57  ;;  %v665_v0 = vpop.f32.mrb[17].mxu0  ;;  %v793_v2 = vpop.f32.mrb[17].mxu1  ;;  %v773_v59 = vadd.f32 %v1731_v5, %v1719_v57 }
 0x146   : > { %v666_v7 = vadd.f32 %v1719_v57, %v665_v0  ;;  %v1235_v8 = vpop.f32.mrb[18].mxu0  ;;  %v1267_v9 = vpop.f32.mrb[18].mxu1 }
 0x147   : > { %v890_v13 = vsel %vm856_vm2, %v674_v63, -inf  ;;  %v677_v44 = vadd.f32 %v1235_v8, %v1719_v57  ;;  %v668_v14 = vpop.f32.mrb[19].mxu0  ;;  %v796_v15 = vpop.f32.mrb[19].mxu1  ;;  %v786_v63 = vadd.f32 %v1759_v25, %v1719_v57  ;;  %v1909_v39 = vsel %vm856_vm2, %v773_v59, -inf }
 0x148   : > { %v1823_v48 = vmax.f32 %v889_v12, %v890_v13  ;;  %v860_v17 = vsel %vm856_vm2, %v666_v7, -inf  ;;  %v669_v18 = vadd.f32 %v1719_v57, %v668_v14  ;;  %v1842_v12 = vsel %vm856_vm2, %v741_v4, -inf }
 0x149   : > { %v1829_v20 = vmax.f32 %v859_v16, %v860_v17  ;;  %v905_v52 = vsel %vm856_vm2, %v677_v44, -inf  ;;  %v1850_v16 = vsel %vm856_vm2, %v754_v42, -inf  ;;  %v789_v4 = vadd.f32 %v1767_v33, %v1719_v57 }
 0x14a   : > { %v1832_v21 = vmax.f32 %v904_v19, %v905_v52  ;;  %v875_v23 = vsel %vm856_vm2, %v669_v18, -inf  ;;  %v1853_v19 = vsel %vm856_vm2, %v746_v11, -inf  ;;  %v802_v33 = vadd.f32 %v1266_v60, %v1719_v57 }
 0x14b   : > { %v1844_v26 = vmax.f32 %v874_v22, %v875_v23  ;;  %v770_v22 = vadd.f32 %v1723_v61, %v1719_v57  ;;  %v794_v11 = vadd.f32 %v1719_v57, %v793_v2  ;;  %v805_v44 = vadd.f32 %v1267_v9, %v1719_v57 }
 0x14c   : > { %v1238_v28 = vpop.f32.mrb[20].mxu0  ;;  %v1270_v30 = vpop.f32.mrb[20].mxu1  ;;  %v797_v34 = vadd.f32 %v1719_v57, %v796_v15  ;;  %v866_v2 = vsel %vm856_vm2, %v762_v32, -inf  ;;  %v1920_v45 = vsel %vm856_vm2, %v786_v63, -inf  ;;  %v1929_v15 = vsel %vm856_vm2, %v781_v10, -inf }
 0x14d   : > { %v690_v36 = vadd.f32 %v1238_v28, %v1719_v57  ;;  %v681_v37 = vpop.f32.mrb[21].mxu0  ;;  %v809_v43 = vpop.f32.mrb[21].mxu1  ;;  %v896_v60 = vsel %vm856_vm2, %v770_v22, -inf  ;;  %v898_v51 = vsel %vm856_vm2, %v802_v33, -inf  ;;  %v818_v55 = vadd.f32 %v1270_v30, %v1719_v57 }
 0x14e   : > { %v682_v0 = vadd.f32 %v1719_v57, %v681_v37  ;;  %v1239_v3 = vpop.f32.mrb[22].mxu0  ;;  %v1271_v61 = vpop.f32.mrb[22].mxu1  ;;  %v868_v18 = vsel %vm856_vm2, %v794_v11, -inf  ;;  %v913_v50 = vsel %vm856_vm2, %v805_v44, -inf  ;;  %v883_v52 = vsel %vm856_vm2, %v797_v34, -inf }
 0x14f   : > { %v950_v6 = vsel %vm856_vm2, %v690_v36, -inf  ;;  %v693_v5 = vadd.f32 %v1239_v3, %v1719_v57  ;;  %v684_v7 = vpop.f32.mrb[23].mxu0  ;;  %v1879_v8 = vpop.f32.mrb[23].mxu1  ;;  %v1951_v10 = vadd.f32 %v1271_v61, %v1719_v57 }
 0x150   : > { %v1886_v25 = vmax.f32 %v949_v40, %v950_v6  ;;  %v920_v29 = vsel %vm856_vm2, %v682_v0, -inf  ;;  %v685_v42 = vadd.f32 %v1719_v57, %v684_v7  ;;  %v810_v6 = vadd.f32 %v1719_v57, %v809_v43 }
 0x151   : > { %v1895_v13 = vmax.f32 %v919_v47, %v920_v29  ;;  %v965_v38 = vsel %vm856_vm2, %v693_v5, -inf  ;;  %v1917_v47 = vsel %vm856_vm2, %v765_v62, -inf }
 0x152   : > { %v1903_v35 = vmax.f32 %v964_v53, %v965_v38  ;;  %v935_v40 = vsel %vm856_vm2, %v685_v42, -inf  ;;  %v1926_v53 = vsel %vm856_vm2, %v789_v4, -inf  ;;  %v958_v4 = vsel %vm856_vm2, %v818_v55, -inf }
 0x153   : > { %v1914_v41 = vmax.f32 %v934_v58, %v935_v40 }
 0x154   : > { %v1242_v9 = vpop.f32.mrb[24].mxu0  ;;  %v1274_v14 = vpop.f32.mrb[24].mxu1 }
 0x155   : > { %v706_v58 = vadd.f32 %v1242_v9, %v1719_v57  ;;  %v697_v46 = vpop.f32.mrb[25].mxu0  ;;  %v825_v17 = vpop.f32.mrb[25].mxu1  ;;  %v834_v30 = vadd.f32 %v1274_v14, %v1719_v57 }
 0x156   : > { %v698_v23 = vadd.f32 %v1719_v57, %v697_v46  ;;  %v1243_v28 = vpop.f32.mrb[26].mxu0  ;;  %v1275_v22 = vpop.f32.mrb[26].mxu1  ;;  %v826_v59 = vadd.f32 %v1719_v57, %v825_v17 }
 0x157   : > { %v892_v32 = vsel %vm856_vm2, %v706_v58, -inf  ;;  %v709_v36 = vadd.f32 %v1243_v28, %v1719_v57  ;;  %v700_v37 = vpop.f32.mrb[27].mxu0  ;;  %v828_v62 = vpop.f32.mrb[27].mxu1  ;;  %v837_v1 = vadd.f32 %v1275_v22, %v1719_v57  ;;  %v900_v38 = vsel %vm856_vm2, %v834_v30, -inf }
 0x158   : > { %v893_v63 = vmax.f32 %v1823_v48, %v892_v32  ;;  %v862_v0 = vsel %vm856_vm2, %v698_v23, -inf  ;;  %v701_v3 = vadd.f32 %v1719_v57, %v700_v37  ;;  %v870_v43 = vsel %vm856_vm2, %v826_v59, -inf }
 0x159   : > { %v863_v5 = vmax.f32 %v1829_v20, %v862_v0  ;;  %v907_v7 = vsel %vm856_vm2, %v709_v36, -inf  ;;  %v915_v61 = vsel %vm856_vm2, %v837_v1, -inf }
 0x15a   : > { %v895_v29 = vmax.f32 %v893_v63, %v1836_v24  ;;  %v908_v48 = vmax.f32 %v1832_v21, %v907_v7  ;;  %v877_v42 = vsel %vm856_vm2, %v701_v3, -inf  ;;  %v829_v24 = vadd.f32 %v1719_v57, %v828_v62 }
 0x15b   : > { %v865_v33 = vmax.f32 %v863_v5, %v1839_v54  ;;  %v878_v11 = vmax.f32 %v1844_v26, %v877_v42  ;;  %v928_v5 = vsel %vm856_vm2, %v810_v6, -inf }
 0x15c   : > { %v910_v20 = vmax.f32 %v908_v48, %v1842_v12  ;;  %v897_v44 = vmax.f32 %v895_v29, %v896_v60  ;;  %v1246_v34 = vpop.f32.mrb[28].mxu0  ;;  %v1278_v40 = vpop.f32.mrb[28].mxu1 }
 0x15d   : > { %v880_v21 = vmax.f32 %v878_v11, %v1847_v56  ;;  %v867_v9 = vmax.f32 %v865_v33, %v866_v2  ;;  %v722_v54 = vadd.f32 %v1246_v34, %v1719_v57  ;;  %v713_v14 = vpop.f32.mrb[29].mxu0  ;;  %v850_v26 = vadd.f32 %v1278_v40, %v1719_v57  ;;  %v841_v55 = vpop.f32.mrb[29].mxu1 }
 0x15e   : > { %v899_v58 = vmax.f32 %v897_v44, %v898_v51  ;;  %v912_v46 = vmax.f32 %v910_v20, %v1909_v39  ;;  %v714_v12 = vadd.f32 %v1719_v57, %v713_v14  ;;  %v1247_v60 = vpop.f32.mrb[30].mxu0  ;;  %v842_v17 = vadd.f32 %v1719_v57, %v841_v55  ;;  %v1279_v23 = vpop.f32.mrb[30].mxu1 }
 0x15f   : > { %v869_v28 = vmax.f32 %v867_v9, %v868_v18  ;;  %v952_v22 = vsel %vm856_vm2, %v722_v54, -inf  ;;  %v882_v56 = vmax.f32 %v880_v21, %v1917_v47  ;;  %v725_v2 = vadd.f32 %v1247_v60, %v1719_v57  ;;  %v716_v32 = vpop.f32.mrb[31].mxu0  ;;  %v844_v36 = vpop.f32.mrb[31].mxu1 }
 0x160   : > { %v901_v37 = vmax.f32 %v899_v58, %v900_v38  ;;  %v914_v30 = vmax.f32 %v912_v46, %v913_v50  ;;  %v953_v51 = vmax.f32 %v1886_v25, %v952_v22  ;;  %v922_v39 = vsel %vm856_vm2, %v714_v12, -inf }
 0x161   : > { %v871_v59 = vmax.f32 %v869_v28, %v870_v43  ;;  %v884_v62 = vmax.f32 %v882_v56, %v883_v52  ;;  %v923_v63 = vmax.f32 %v1895_v13, %v922_v39  ;;  %v967_v18 = vsel %vm856_vm2, %v725_v2, -inf }
 0x162   : > { %v916_v0 = vmax.f32 %v914_v30, %v915_v61  ;;  %v955_v3 = vmax.f32 %v953_v51, %v1850_v16  ;;  %v885_v47 = vsel %vm856_vm2, %v829_v24, -inf  ;;  %v968_v1 = vmax.f32 %v1903_v35, %v967_v18 }
 0x163   : > { %v886_v50 = vmax.f32 %v884_v62, %v885_v47  ;;  %v925_v25 = vmax.f32 %v923_v63, %v1853_v19  ;;  %v717_v7 = vadd.f32 %v1719_v57, %v716_v32  ;;  %v977_v52 = vsel %vm856_vm2, %v871_v59, 0.0 }
 0x164   : > { %v970_v13 = vmax.f32 %v968_v1, %v1856_v27  ;;  %v957_v29 = vmax.f32 %v955_v3, %v1920_v45  ;;  %v960_v48 = vsel %vm856_vm2, %v850_v26, -inf  ;;  %v930_v6 = vsel %vm856_vm2, %v842_v17, -inf }
 0x165   : > { %v978_v16 = vsel %vm856_vm2, %v886_v50, 0.0  ;;  %v937_v42 = vsel %vm856_vm2, %v717_v7, -inf  ;;  %v927_v35 = vmax.f32 %v925_v25, %v1923_v49  ;;  %v853_v38 = vadd.f32 %v1279_v23, %v1719_v57 }
 0x166   : > { %v979_v33 = vadd.f32 %v978_v16, %v977_v52  ;;  %v938_v19 = vmax.f32 %v1914_v41, %v937_v42  ;;  %v959_v11 = vmax.f32 %v957_v29, %v958_v4  ;;  %v813_v27 = vadd.f32 %v1719_v57, %v1879_v8 }
 0x167   : > { %v980_v45 = vsel %vm856_vm2, %v901_v37, 0.0  ;;  %v929_v43 = vmax.f32 %v927_v35, %v928_v5  ;;  %v972_v20 = vmax.f32 %v970_v13, %v1926_v53  ;;  %v973_v44 = vsel %vm856_vm2, %v1951_v10, -inf }
 0x168   : > { %v981_v49 = vadd.f32 %v980_v45, %v979_v33  ;;  %v940_v61 = vmax.f32 %v938_v19, %v1859_v31  ;;  %v961_v34 = vmax.f32 %v959_v11, %v960_v48  ;;  %v982_v41 = vsel %vm856_vm2, %v916_v0, 0.0 }
 0x169   : > { %v931_v4 = vmax.f32 %v929_v43, %v930_v6  ;;  %v845_v24 = vadd.f32 %v1719_v57, %v844_v36  ;;  %v974_v40 = vmax.f32 %v972_v20, %v973_v44  ;;  %v975_v8 = vsel %vm856_vm2, %v853_v38, -inf }
 0x16a   : > { %v942_v21 = vmax.f32 %v940_v61, %v1929_v15  ;;  %v983_v9 = vadd.f32 %v982_v41, %v981_v49  ;;  %v943_v53 = vsel %vm856_vm2, %v813_v27, -inf  ;;  %v988_v46 = vsel %vm856_vm2, %v961_v34, 0.0 }
 0x16b   : > { %v984_v54 = vsel %vm856_vm2, %v931_v4, 0.0  ;;  %v976_v10 = vmax.f32 %v974_v40, %v975_v8  ;;  %v945_v31 = vsel %vm856_vm2, %v845_v24, -inf }
 0x16c   : > { %v944_v14 = vmax.f32 %v942_v21, %v943_v53  ;;  %v985_v26 = vadd.f32 %v984_v54, %v983_v9 }
 0x16d   : > { %v990_v15 = vsel %vm856_vm2, %v976_v10, 0.0 }
 0x16e   : > { %v946_v55 = vmax.f32 %v944_v14, %v945_v31 }
 0x170   : > { %v986_v58 = vsel %vm856_vm2, %v946_v55, 0.0 }
 0x171   : > { %v987_v57 = vadd.f32 %v986_v58, %v985_v26 }
 0x173   : > { %v989_v12 = vadd.f32 %v988_v46, %v987_v57 }
 0x175   : > { %v991_v60 = vadd.f32 %v990_v15, %v989_v12 }
 0x177   : > { %992 = vadd.xlane.f32.xlu0 %v991_v60 }
 0x204   : > { %v993_v17 = vpop.xlane.xlu0 %992 }
 0x205   : > { %v994_v23 = vrot.slane %v993_v17, 4 }
 0x207   : > { %v995_v28 = vadd.f32 %v994_v23, %v993_v17 }
 0x209   : > { %v996_v22 = vrot.slane %v995_v28, 2 }
 0x20b   : > { %v997_v56 = vadd.f32 %v996_v22, %v995_v28 }
 0x20d   : > { %v998_v2 = vrot.slane %v997_v56, 1 }
 0x20f   : > { %v999_v32 = vadd.f32 %v998_v2, %v997_v56 }
 0x211   : > { %1292 = vpush %v999_v32 }
 0x242   : > { %s1293_s4 = spop %1292 }
 0x243   : > { %s1001_s6 = smul.f32 0.015625, %s1293_s4 }
 0x245   : > { %v1002_v36 = vstv %s1001_s6 }
 0x246   : > { %1003 = vst [vmem:[%s187_s9] sm:$0x1] %v1002_v36 }
 0x247   : > { %1424 = shalt.err (!%p1421_p2)
}
 0x248   : > { %s1425_s5 = scalar_lea.hbm %s2014_s17, 16  ;;  %s1429_s28 = scalar_lea.hbm %s2061_s3, 32 }
 0x249   : > { %p1426_p4 = scmp.ne.s32.totalorder %s2014_s17, %s1425_s5  ;;  %p1430_p9 = scmp.lt.u32.totalorder %s2014_s17, %s2061_s3 }
 0x24a   : > { %p1431_p1 = scmp.lt.u32.totalorder %s1429_s28, %s1425_s5  ;;  %p1433_p6 = scmp.lt.u32.totalorder %s1425_s5, %s2014_s17 }
 0x24b   : > { %p1427_p5 = pnand %p1426_p4, %p2068_p11 }
 0x24c   : > { %p1432_p3 = por %p1431_p1, %p1430_p9 }
 0x24d   : > { %p1428_p7 = pneg %p1427_p5 }
 0x24e   : > { %p1434_p12 = por %p1433_p6, %p1432_p3 }
 0x250   : > { %p1435_p13 = pnand %p1434_p12, %p1428_p7 }
 0x252   : > { %1438 = shalt.err (!%p1435_p13)
}
 0x253   : > { %1296 = dma.vmem_to_hbm [thread:$0]  (%p2068_p11), %s2016_s10, 16, %s2014_s17, %s1005_s19  }
 0x254 PF: > { %s1029_s9 = sand.u32 1, %s1465_s12   ;;  %p2069_p8 = scmp.ne.s32.totalorder %s2066_s25, 0 }
 0x255   : > { %p2070_p10 = scmp.ge.s32.totalorder %s1477_s15, 2  ;;  %s1030_s11 = scalar_lea.sflag [#allocation4], %s1029_s9 }
 0x257   : > { %p1303_p0 = pnand %p2070_p10, %p2069_p8 }
 0x259   : > { %1460 = dma.done.wait (!%p1303_p0), %s1030_s11, 16  }
 0x25a   : > { %1462 = vsyncadd (!%p1303_p0), %s1030_s11, 4294967280  ;;  %p16_p2 = scmp.ge.s32.totalorder %s1529_s18, 4   ;;  %s2071_s12 = smov %s1469_s13 }
 0x25b   : > { %s2072_s13 = smov %s1473_s14  ;;  %s2073_s14 = smov %s1541_s21 }
 0x25c   : > { %s2074_s15 = smov %s1529_s18  ;;  %18 = sbr.rel (!%p16_p2) target bundleno = 5 (0x5), region = 77 }
 0x263   :  { %1034 = vsyncpa [#allocation3], 1 }
 0x264   :  { %1036 = vsyncpa [#allocation3 + $0x1], 1 }
 0x265   :  { %1037 = vsyncpa [#allocation4], 1 }
 0x266   :  { %1039 = vsyncpa [#allocation4 + $0x1], 1 }

</bundles_post_ra>
